<compile_context>
chip_gen: v7x
topology: tpu7x:2x2x1
jax: 0.10.0
libtpu: 0.0.40
codegen_flags: <defaults>
</compile_context>

<pallas_src>
import math

import numpy as np
import jax
import jax.numpy as jnp
from jax.experimental import pallas as pl
from jax.experimental.pallas import tpu as pltpu

D_MODEL = 32
N_HEADS = 4
HEAD_DIM = D_MODEL // N_HEADS
SEQ = 8
BATCH = 2


# ----------------------------- fused kernel ---------------------------------

def _build_kernel(seq_len, n_batch, n_heads, head_dim):
    """Fused MHA forward.  x rows are seq-major: row m = l * n_batch + n."""
    L, N, H, hd = seq_len, n_batch, n_heads, head_dim
    E = H * hd

    def kernel(x_ref, w_qkv_ref, b_qkv_ref, w_out_ref, b_out_ref, y_ref):
        x = x_ref[...]                                            # (M, E)

        # (1) Single fused QKV projection (one MXU push, 96 output lanes).
        qkv = jnp.dot(x, w_qkv_ref[...],
                      preferred_element_type=jnp.float32) + b_qkv_ref[...]   # (M, 3E)

        # Regroup (l, n)-major rows into (G = N*H, L, hd) head/batch groups.
        # Leading-dim split only; per-group pieces are static sublane/lane
        # slices inside the first (8,128) tile -- cheap VPU/XLU work.
        qkv3 = qkv.reshape(L, N, 3 * E)

        def gather(col0):
            slabs = []
            for n in range(N):
                for h in range(H):
                    lo = col0 + h * hd
                    slabs.append(qkv3[:, n, lo:lo + hd])          # (L, hd)
            return jnp.stack(slabs, axis=0)                       # (G, L, hd)

        q3 = gather(0)             # 1/sqrt(hd) already folded into the q weights
        k3 = gather(E)
        v3 = gather(2 * E)

        # (2) Head-batched attention: ONE scores dot + ONE PV dot over G groups.
        s = jnp.einsum("gqd,gkd->gqk", q3, k3,
                       preferred_element_type=jnp.float32)        # (G, L, L)
        s = s - jnp.max(s, axis=-1, keepdims=True)
        e = jnp.exp(s)
        p = e / jnp.sum(e, axis=-1, keepdims=True)                # exact divide
        o3 = jnp.einsum("gqk,gkd->gqd", p, v3,
                        preferred_element_type=jnp.float32)       # (G, L, hd)

        # Scatter heads back to one lane-dense (M, E) slab (rows l*N + n).
        per_batch = []
        for n in range(N):
            per_batch.append(jnp.concatenate(
                [o3[n * H + h] for h in range(H)], axis=-1))      # (L, E)
        o = jnp.stack(per_batch, axis=1).reshape(L * N, E)        # (M, E)

        # (3) Single fused output projection (K = E = 32 contraction).
        y_ref[...] = jnp.dot(o, w_out_ref[...],
                             preferred_element_type=jnp.float32) + b_out_ref[...]

    return kernel


# ----------------------------- host-side weight fold -------------------------

def _fold_params(params, E, H):
    """Fold the chained linears once, on the host, in float64.

    q' = (x @ Wqkv_q^T + b_qkv_q) @ Win_q^T + b_in_q
       =  x @ (Win_q @ Wqkv_q)^T + (Win_q @ b_qkv_q + b_in_q)
    (same for k/v); the 1/sqrt(hd) attention scale is folded into the q fold.
    out_proj followed by to_out folds the same way.  The folded weights are
    returned LANE-DENSE: W_qkv_eff is (E, 3E) = q|k|v (head-major inside each
    third), W_out_eff is (E, E).
    """
    hd = E // H
    g = lambda name: np.asarray(params[name], dtype=np.float64)
    w_qkv, b_qkv = g("w_qkv"), g("b_qkv")
    w_in, b_in = g("w_in"), g("b_in")
    w_po, b_po = g("w_attn_out"), g("b_attn_out")      # attn.out_proj
    w_to, b_to = g("w_to_out"), g("b_to_out")          # to_out

    def fold(lo, hi, scale=1.0):
        w = (w_in[lo:hi] @ w_qkv[lo:hi]) * scale                        # (E, E)
        b = (w_in[lo:hi] @ b_qkv[lo:hi] + b_in[lo:hi]) * scale          # (E,)
        return w, b

    wq, bq = fold(0, E, 1.0 / math.sqrt(hd))
    wk, bk = fold(E, 2 * E)
    wv, bv = fold(2 * E, 3 * E)
    wo = w_to @ w_po                                                    # (E, E)
    bo = w_to @ b_po + b_to                                             # (E,)

    w_qkv_eff = np.concatenate([wq.T, wk.T, wv.T], axis=1)              # (E, 3E)
    b_qkv_eff = np.concatenate([bq, bk, bv]).reshape(1, 3 * E)          # (1, 3E)
    w_out_eff = wo.T                                                    # (E, E)
    b_out_eff = bo.reshape(1, E)                                        # (1, E)

    f32 = lambda a: jnp.asarray(a, dtype=jnp.float32)
    return f32(w_qkv_eff), f32(b_qkv_eff), f32(w_out_eff), f32(b_out_eff)


# ----------------------------- wrapper ---------------------------------------

def multi_head_attention(x, params, attn_mask=None, pad_mask=None):
    """Eval-mode MultiHeadAttention forward for x of shape (L, N, E)."""
    # TODO(synk): attn_mask / key_padding_mask paths and train-mode dropout are
    # not implemented; this is the masks=None, eval-mode forward (dropout = id).
    assert attn_mask is None and pad_mask is None
    L, N, E = x.shape
    H = N_HEADS
    hd = E // H
    M = L * N

    w_qkv_eff, b_qkv_eff, w_out_eff, b_out_eff = _fold_params(params, E, H)

    # No wrapper transposes: (L, N, E) -> (M, E) is a free leading-dim merge.
    x2d = x.reshape(M, E)

    def full(shape):
        return pl.BlockSpec(shape, lambda i: (0,) * len(shape))

    y2d = pl.pallas_call(
        _build_kernel(L, N, H, hd),
        grid=(1,),                       # single grid step; everything in VMEM
        in_specs=[
            full((M, E)),                # x (seq-major rows)
            full((E, 3 * E)),            # fused, lane-dense QKV weight
            full((1, 3 * E)),            # fused QKV bias
            full((E, E)),                # fused output projection
            full((1, E)),                # fused output bias
        ],
        out_specs=full((M, E)),
        out_shape=jax.ShapeDtypeStruct((M, E), jnp.float32),
        compiler_params=pltpu.CompilerParams(
            dimension_semantics=("arbitrary",)),          # tiny problem: one TC
    )(x2d, w_qkv_eff, b_qkv_eff, w_out_eff, b_out_eff)

    return y2d.reshape(L, N, E)          # free leading-dim split back to (L, N, E)


# ----------------------------- reference & init ------------------------------

def reference(x, params):
    """Unfolded float64 reference mirroring the PyTorch op order (eval mode)."""
    x = np.asarray(x, dtype=np.float64)
    p = {k: np.asarray(v, dtype=np.float64) for k, v in params.items()}
    L, N, E = x.shape
    H, hd = N_HEADS, E // N_HEADS

    qkv = x @ p["w_qkv"].T + p["b_qkv"]
    q, k, v = np.split(qkv, 3, axis=-1)
    w_in, b_in = p["w_in"], p["b_in"]
    q = q @ w_in[:E].T + b_in[:E]
    k = k @ w_in[E:2 * E].T + b_in[E:2 * E]
    v = v @ w_in[2 * E:].T + b_in[2 * E:]

    sh = lambda t: t.reshape(L, N * H, hd).transpose(1, 0, 2)    # (N*H, L, hd)
    qh, kh, vh = sh(q), sh(k), sh(v)
    s = qh @ kh.transpose(0, 2, 1) / math.sqrt(hd)
    s = s - s.max(axis=-1, keepdims=True)
    e = np.exp(s)
    a = (e / e.sum(axis=-1, keepdims=True)) @ vh                 # (N*H, L, hd)
    a = a.transpose(1, 0, 2).reshape(L, N, E)
    a = a @ p["w_attn_out"].T + p["b_attn_out"]
    return a @ p["w_to_out"].T + p["b_to_out"]


def init_params(key):
    E = D_MODEL
    ks = jax.random.split(key, 8)
    bound = 1.0 / math.sqrt(E)
    u = lambda k, shape: jax.random.uniform(k, shape, jnp.float32, -bound, bound)
    return {
        "w_qkv": u(ks[0], (3 * E, E)),       # to_qkv.weight
        "b_qkv": u(ks[1], (3 * E,)),         # to_qkv.bias
        "w_in": u(ks[2], (3 * E, E)),        # attn.in_proj_weight
        "b_in": u(ks[3], (3 * E,)),          # attn.in_proj_bias
        "w_attn_out": u(ks[4], (E, E)),      # attn.out_proj.weight
        "b_attn_out": u(ks[5], (E,)),        # attn.out_proj.bias
        "w_to_out": u(ks[6], (E, E)),        # to_out.weight
        "b_to_out": u(ks[7], (E,)),          # to_out.bias
    }


if __name__ == "__main__":
    key = jax.random.PRNGKey(0)
    k_x, k_p = jax.random.split(key)
    x = jax.random.normal(k_x, (SEQ, BATCH, D_MODEL), dtype=jnp.float32)
    params = init_params(k_p)

    out = jax.block_until_ready(multi_head_attention(x, params))
    ref = reference(x, params)

    assert out.shape == (SEQ, BATCH, D_MODEL)
    # Exact softmax division (no approx reciprocal) -> remaining budget only
    # covers MXU f32-pass rounding and folded-vs-chained weight reassociation
    # against the float64 reference.
    err = float(np.max(np.abs(np.asarray(out, dtype=np.float64) - ref)))
    assert np.allclose(np.asarray(out, dtype=np.float64), ref,
                       atol=1e-3, rtol=1e-3), err

    print("KERNEL_OK")
</pallas_src>

<mosaic_0001>
module attributes {stable_mosaic.version = 11 : i64} {
  func.func @kernel(%arg0: i32, %arg1: memref<16x32xf32, #tpu.memory_space<vmem>>, %arg2: memref<32x96xf32, #tpu.memory_space<vmem>>, %arg3: memref<1x96xf32, #tpu.memory_space<vmem>>, %arg4: memref<32x32xf32, #tpu.memory_space<vmem>>, %arg5: memref<1x32xf32, #tpu.memory_space<vmem>>, %arg6: memref<16x32xf32, #tpu.memory_space<vmem>>) attributes {dimension_semantics = [#tpu.dimension_semantics<arbitrary>], iteration_bounds = array<i64: 1>, scalar_prefetch = 0 : i64, scratch_operands = 0 : i64, tpu.core_type = #tpu.core_type<tc>, window_params = [{pipeline_mode = #tpu.pipeline_mode<synchronous>, transform_indices = @transform_0, window_bounds = array<i64: 16, 32>}, {pipeline_mode = #tpu.pipeline_mode<synchronous>, transform_indices = @transform_1, window_bounds = array<i64: 32, 96>}, {pipeline_mode = #tpu.pipeline_mode<synchronous>, transform_indices = @transform_2, window_bounds = array<i64: 1, 96>}, {pipeline_mode = #tpu.pipeline_mode<synchronous>, transform_indices = @transform_3, window_bounds = array<i64: 32, 32>}, {pipeline_mode = #tpu.pipeline_mode<synchronous>, transform_indices = @transform_4, window_bounds = array<i64: 1, 32>}, {pipeline_mode = #tpu.pipeline_mode<synchronous>, transform_indices = @transform_5, window_bounds = array<i64: 16, 32>}]} {
    %c0 = arith.constant 0 : index
    %c0_0 = arith.constant 0 : index
    %0 = vector.load %arg1[%c0, %c0_0] : memref<16x32xf32, #tpu.memory_space<vmem>>, vector<16x32xf32>
    %c0_1 = arith.constant 0 : index
    %c0_2 = arith.constant 0 : index
    %1 = vector.load %arg2[%c0_1, %c0_2] : memref<32x96xf32, #tpu.memory_space<vmem>>, vector<32x96xf32>
    %cst = arith.constant dense<0.000000e+00> : vector<16x96xf32>
    %2 = tpu.matmul %0, %1, %cst {dimension_numbers = #tpu.dot_dimension_numbers<[1], [0], [0], [1], [0, 0, 1, 1], [], []>} : vector<16x32xf32>, vector<32x96xf32>, vector<16x96xf32> -> vector<16x96xf32>
    %c0_3 = arith.constant 0 : index
    %c0_4 = arith.constant 0 : index
    %3 = vector.load %arg3[%c0_3, %c0_4] : memref<1x96xf32, #tpu.memory_space<vmem>>, vector<1x96xf32>
    %4 = vector.broadcast %3 : vector<1x96xf32> to vector<16x96xf32>
    %5 = arith.addf %2, %4 : vector<16x96xf32>
    %6 = vector.shape_cast %5 : vector<16x96xf32> to vector<8x2x96xf32>
    %7 = vector.extract_strided_slice %6 {offsets = [0, 0, 0], sizes = [8, 1, 8], strides = [1, 1, 1]} : vector<8x2x96xf32> to vector<8x1x8xf32>
    %8 = vector.shape_cast %7 : vector<8x1x8xf32> to vector<8x8xf32>
    %9 = vector.extract_strided_slice %6 {offsets = [0, 0, 8], sizes = [8, 1, 8], strides = [1, 1, 1]} : vector<8x2x96xf32> to vector<8x1x8xf32>
    %10 = vector.shape_cast %9 : vector<8x1x8xf32> to vector<8x8xf32>
    %11 = vector.extract_strided_slice %6 {offsets = [0, 0, 16], sizes = [8, 1, 8], strides = [1, 1, 1]} : vector<8x2x96xf32> to vector<8x1x8xf32>
    %12 = vector.shape_cast %11 : vector<8x1x8xf32> to vector<8x8xf32>
    %13 = vector.extract_strided_slice %6 {offsets = [0, 0, 24], sizes = [8, 1, 8], strides = [1, 1, 1]} : vector<8x2x96xf32> to vector<8x1x8xf32>
    %14 = vector.shape_cast %13 : vector<8x1x8xf32> to vector<8x8xf32>
    %15 = vector.extract_strided_slice %6 {offsets = [0, 1, 0], sizes = [8, 1, 8], strides = [1, 1, 1]} : vector<8x2x96xf32> to vector<8x1x8xf32>
    %16 = vector.shape_cast %15 : vector<8x1x8xf32> to vector<8x8xf32>
    %17 = vector.extract_strided_slice %6 {offsets = [0, 1, 8], sizes = [8, 1, 8], strides = [1, 1, 1]} : vector<8x2x96xf32> to vector<8x1x8xf32>
    %18 = vector.shape_cast %17 : vector<8x1x8xf32> to vector<8x8xf32>
    %19 = vector.extract_strided_slice %6 {offsets = [0, 1, 16], sizes = [8, 1, 8], strides = [1, 1, 1]} : vector<8x2x96xf32> to vector<8x1x8xf32>
    %20 = vector.shape_cast %19 : vector<8x1x8xf32> to vector<8x8xf32>
    %21 = vector.extract_strided_slice %6 {offsets = [0, 1, 24], sizes = [8, 1, 8], strides = [1, 1, 1]} : vector<8x2x96xf32> to vector<8x1x8xf32>
    %22 = vector.shape_cast %21 : vector<8x1x8xf32> to vector<8x8xf32>
    %23 = vector.shape_cast %8 : vector<8x8xf32> to vector<1x8x8xf32>
    %24 = vector.shape_cast %10 : vector<8x8xf32> to vector<1x8x8xf32>
    %25 = vector.shape_cast %12 : vector<8x8xf32> to vector<1x8x8xf32>
    %26 = vector.shape_cast %14 : vector<8x8xf32> to vector<1x8x8xf32>
    %27 = vector.shape_cast %16 : vector<8x8xf32> to vector<1x8x8xf32>
    %28 = vector.shape_cast %18 : vector<8x8xf32> to vector<1x8x8xf32>
    %29 = vector.shape_cast %20 : vector<8x8xf32> to vector<1x8x8xf32>
    %30 = vector.shape_cast %22 : vector<8x8xf32> to vector<1x8x8xf32>
    %31 = tpu.concatenate %23, %24, %25, %26, %27, %28, %29, %30 in 0 : vector<1x8x8xf32>, vector<1x8x8xf32>, vector<1x8x8xf32>, vector<1x8x8xf32>, vector<1x8x8xf32>, vector<1x8x8xf32>, vector<1x8x8xf32>, vector<1x8x8xf32> -> vector<8x8x8xf32>
    %32 = vector.extract_strided_slice %6 {offsets = [0, 0, 32], sizes = [8, 1, 8], strides = [1, 1, 1]} : vector<8x2x96xf32> to vector<8x1x8xf32>
    %33 = vector.shape_cast %32 : vector<8x1x8xf32> to vector<8x8xf32>
    %34 = vector.extract_strided_slice %6 {offsets = [0, 0, 40], sizes = [8, 1, 8], strides = [1, 1, 1]} : vector<8x2x96xf32> to vector<8x1x8xf32>
    %35 = vector.shape_cast %34 : vector<8x1x8xf32> to vector<8x8xf32>
    %36 = vector.extract_strided_slice %6 {offsets = [0, 0, 48], sizes = [8, 1, 8], strides = [1, 1, 1]} : vector<8x2x96xf32> to vector<8x1x8xf32>
    %37 = vector.shape_cast %36 : vector<8x1x8xf32> to vector<8x8xf32>
    %38 = vector.extract_strided_slice %6 {offsets = [0, 0, 56], sizes = [8, 1, 8], strides = [1, 1, 1]} : vector<8x2x96xf32> to vector<8x1x8xf32>
    %39 = vector.shape_cast %38 : vector<8x1x8xf32> to vector<8x8xf32>
    %40 = vector.extract_strided_slice %6 {offsets = [0, 1, 32], sizes = [8, 1, 8], strides = [1, 1, 1]} : vector<8x2x96xf32> to vector<8x1x8xf32>
    %41 = vector.shape_cast %40 : vector<8x1x8xf32> to vector<8x8xf32>
    %42 = vector.extract_strided_slice %6 {offsets = [0, 1, 40], sizes = [8, 1, 8], strides = [1, 1, 1]} : vector<8x2x96xf32> to vector<8x1x8xf32>
    %43 = vector.shape_cast %42 : vector<8x1x8xf32> to vector<8x8xf32>
    %44 = vector.extract_strided_slice %6 {offsets = [0, 1, 48], sizes = [8, 1, 8], strides = [1, 1, 1]} : vector<8x2x96xf32> to vector<8x1x8xf32>
    %45 = vector.shape_cast %44 : vector<8x1x8xf32> to vector<8x8xf32>
    %46 = vector.extract_strided_slice %6 {offsets = [0, 1, 56], sizes = [8, 1, 8], strides = [1, 1, 1]} : vector<8x2x96xf32> to vector<8x1x8xf32>
    %47 = vector.shape_cast %46 : vector<8x1x8xf32> to vector<8x8xf32>
    %48 = vector.shape_cast %33 : vector<8x8xf32> to vector<1x8x8xf32>
    %49 = vector.shape_cast %35 : vector<8x8xf32> to vector<1x8x8xf32>
    %50 = vector.shape_cast %37 : vector<8x8xf32> to vector<1x8x8xf32>
    %51 = vector.shape_cast %39 : vector<8x8xf32> to vector<1x8x8xf32>
    %52 = vector.shape_cast %41 : vector<8x8xf32> to vector<1x8x8xf32>
    %53 = vector.shape_cast %43 : vector<8x8xf32> to vector<1x8x8xf32>
    %54 = vector.shape_cast %45 : vector<8x8xf32> to vector<1x8x8xf32>
    %55 = vector.shape_cast %47 : vector<8x8xf32> to vector<1x8x8xf32>
    %56 = tpu.concatenate %48, %49, %50, %51, %52, %53, %54, %55 in 0 : vector<1x8x8xf32>, vector<1x8x8xf32>, vector<1x8x8xf32>, vector<1x8x8xf32>, vector<1x8x8xf32>, vector<1x8x8xf32>, vector<1x8x8xf32>, vector<1x8x8xf32> -> vector<8x8x8xf32>
    %57 = vector.extract_strided_slice %6 {offsets = [0, 0, 64], sizes = [8, 1, 8], strides = [1, 1, 1]} : vector<8x2x96xf32> to vector<8x1x8xf32>
    %58 = vector.shape_cast %57 : vector<8x1x8xf32> to vector<8x8xf32>
    %59 = vector.extract_strided_slice %6 {offsets = [0, 0, 72], sizes = [8, 1, 8], strides = [1, 1, 1]} : vector<8x2x96xf32> to vector<8x1x8xf32>
    %60 = vector.shape_cast %59 : vector<8x1x8xf32> to vector<8x8xf32>
    %61 = vector.extract_strided_slice %6 {offsets = [0, 0, 80], sizes = [8, 1, 8], strides = [1, 1, 1]} : vector<8x2x96xf32> to vector<8x1x8xf32>
    %62 = vector.shape_cast %61 : vector<8x1x8xf32> to vector<8x8xf32>
    %63 = vector.extract_strided_slice %6 {offsets = [0, 0, 88], sizes = [8, 1, 8], strides = [1, 1, 1]} : vector<8x2x96xf32> to vector<8x1x8xf32>
    %64 = vector.shape_cast %63 : vector<8x1x8xf32> to vector<8x8xf32>
    %65 = vector.extract_strided_slice %6 {offsets = [0, 1, 64], sizes = [8, 1, 8], strides = [1, 1, 1]} : vector<8x2x96xf32> to vector<8x1x8xf32>
    %66 = vector.shape_cast %65 : vector<8x1x8xf32> to vector<8x8xf32>
    %67 = vector.extract_strided_slice %6 {offsets = [0, 1, 72], sizes = [8, 1, 8], strides = [1, 1, 1]} : vector<8x2x96xf32> to vector<8x1x8xf32>
    %68 = vector.shape_cast %67 : vector<8x1x8xf32> to vector<8x8xf32>
    %69 = vector.extract_strided_slice %6 {offsets = [0, 1, 80], sizes = [8, 1, 8], strides = [1, 1, 1]} : vector<8x2x96xf32> to vector<8x1x8xf32>
    %70 = vector.shape_cast %69 : vector<8x1x8xf32> to vector<8x8xf32>
    %71 = vector.extract_strided_slice %6 {offsets = [0, 1, 88], sizes = [8, 1, 8], strides = [1, 1, 1]} : vector<8x2x96xf32> to vector<8x1x8xf32>
    %72 = vector.shape_cast %71 : vector<8x1x8xf32> to vector<8x8xf32>
    %73 = vector.shape_cast %58 : vector<8x8xf32> to vector<1x8x8xf32>
    %74 = vector.shape_cast %60 : vector<8x8xf32> to vector<1x8x8xf32>
    %75 = vector.shape_cast %62 : vector<8x8xf32> to vector<1x8x8xf32>
    %76 = vector.shape_cast %64 : vector<8x8xf32> to vector<1x8x8xf32>
    %77 = vector.shape_cast %66 : vector<8x8xf32> to vector<1x8x8xf32>
    %78 = vector.shape_cast %68 : vector<8x8xf32> to vector<1x8x8xf32>
    %79 = vector.shape_cast %70 : vector<8x8xf32> to vector<1x8x8xf32>
    %80 = vector.shape_cast %72 : vector<8x8xf32> to vector<1x8x8xf32>
    %81 = tpu.concatenate %73, %74, %75, %76, %77, %78, %79, %80 in 0 : vector<1x8x8xf32>, vector<1x8x8xf32>, vector<1x8x8xf32>, vector<1x8x8xf32>, vector<1x8x8xf32>, vector<1x8x8xf32>, vector<1x8x8xf32>, vector<1x8x8xf32> -> vector<8x8x8xf32>
    "tpu.trace_start"() <{level = 10 : i32, message = "gqd,gkd->gqk"}> : () -> ()
    %cst_5 = arith.constant dense<0.000000e+00> : vector<8x8x8xf32>
    %82 = tpu.matmul %31, %56, %cst_5 {dimension_numbers = #tpu.dot_dimension_numbers<[2], [2], [1], [1], [0, 0, 0, 1, 1, 1], [0], [0]>} : vector<8x8x8xf32>, vector<8x8x8xf32>, vector<8x8x8xf32> -> vector<8x8x8xf32>
    "tpu.trace_stop"() : () -> ()
    %cst_6 = arith.constant dense<0xFF800000> : vector<8x8xf32>
    %83 = vector.multi_reduction <maximumf>, %82, %cst_6 [2] : vector<8x8x8xf32> to vector<8x8xf32>
    %84 = vector.shape_cast %83 : vector<8x8xf32> to vector<8x8x1xf32>
    %85 = vector.broadcast %84 : vector<8x8x1xf32> to vector<8x8x8xf32>
    %86 = arith.subf %82, %85 : vector<8x8x8xf32>
    %87 = math.exp %86 : vector<8x8x8xf32>
    %cst_7 = arith.constant dense<0.000000e+00> : vector<8x8xf32>
    %88 = vector.multi_reduction <add>, %87, %cst_7 [2] : vector<8x8x8xf32> to vector<8x8xf32>
    %89 = vector.shape_cast %88 : vector<8x8xf32> to vector<8x8x1xf32>
    %90 = vector.broadcast %89 : vector<8x8x1xf32> to vector<8x8x8xf32>
    %91 = arith.divf %87, %90 : vector<8x8x8xf32>
    "tpu.trace_start"() <{level = 10 : i32, message = "gqk,gkd->gqd"}> : () -> ()
    %cst_8 = arith.constant dense<0.000000e+00> : vector<8x8x8xf32>
    %92 = tpu.matmul %91, %81, %cst_8 {dimension_numbers = #tpu.dot_dimension_numbers<[2], [1], [1], [2], [0, 0, 0, 1, 1, 2], [0], [0]>} : vector<8x8x8xf32>, vector<8x8x8xf32>, vector<8x8x8xf32> -> vector<8x8x8xf32>
    "tpu.trace_stop"() : () -> ()
    %93 = vector.extract_strided_slice %92 {offsets = [0, 0, 0], sizes = [1, 8, 8], strides = [1, 1, 1]} : vector<8x8x8xf32> to vector<1x8x8xf32>
    %94 = vector.shape_cast %93 : vector<1x8x8xf32> to vector<8x8xf32>
    %95 = vector.extract_strided_slice %92 {offsets = [1, 0, 0], sizes = [1, 8, 8], strides = [1, 1, 1]} : vector<8x8x8xf32> to vector<1x8x8xf32>
    %96 = vector.shape_cast %95 : vector<1x8x8xf32> to vector<8x8xf32>
    %97 = vector.extract_strided_slice %92 {offsets = [2, 0, 0], sizes = [1, 8, 8], strides = [1, 1, 1]} : vector<8x8x8xf32> to vector<1x8x8xf32>
    %98 = vector.shape_cast %97 : vector<1x8x8xf32> to vector<8x8xf32>
    %99 = vector.extract_strided_slice %92 {offsets = [3, 0, 0], sizes = [1, 8, 8], strides = [1, 1, 1]} : vector<8x8x8xf32> to vector<1x8x8xf32>
    %100 = vector.shape_cast %99 : vector<1x8x8xf32> to vector<8x8xf32>
    %101 = tpu.concatenate %94, %96, %98, %100 in 1 : vector<8x8xf32>, vector<8x8xf32>, vector<8x8xf32>, vector<8x8xf32> -> vector<8x32xf32>
    %102 = vector.extract_strided_slice %92 {offsets = [4, 0, 0], sizes = [1, 8, 8], strides = [1, 1, 1]} : vector<8x8x8xf32> to vector<1x8x8xf32>
    %103 = vector.shape_cast %102 : vector<1x8x8xf32> to vector<8x8xf32>
    %104 = vector.extract_strided_slice %92 {offsets = [5, 0, 0], sizes = [1, 8, 8], strides = [1, 1, 1]} : vector<8x8x8xf32> to vector<1x8x8xf32>
    %105 = vector.shape_cast %104 : vector<1x8x8xf32> to vector<8x8xf32>
    %106 = vector.extract_strided_slice %92 {offsets = [6, 0, 0], sizes = [1, 8, 8], strides = [1, 1, 1]} : vector<8x8x8xf32> to vector<1x8x8xf32>
    %107 = vector.shape_cast %106 : vector<1x8x8xf32> to vector<8x8xf32>
    %108 = vector.extract_strided_slice %92 {offsets = [7, 0, 0], sizes = [1, 8, 8], strides = [1, 1, 1]} : vector<8x8x8xf32> to vector<1x8x8xf32>
    %109 = vector.shape_cast %108 : vector<1x8x8xf32> to vector<8x8xf32>
    %110 = tpu.concatenate %103, %105, %107, %109 in 1 : vector<8x8xf32>, vector<8x8xf32>, vector<8x8xf32>, vector<8x8xf32> -> vector<8x32xf32>
    %111 = vector.shape_cast %101 : vector<8x32xf32> to vector<8x1x32xf32>
    %112 = vector.shape_cast %110 : vector<8x32xf32> to vector<8x1x32xf32>
    %113 = tpu.concatenate %111, %112 in 1 : vector<8x1x32xf32>, vector<8x1x32xf32> -> vector<8x2x32xf32>
    %114 = vector.shape_cast %113 : vector<8x2x32xf32> to vector<16x32xf32>
    %c0_9 = arith.constant 0 : index
    %c0_10 = arith.constant 0 : index
    %115 = vector.load %arg4[%c0_9, %c0_10] : memref<32x32xf32, #tpu.memory_space<vmem>>, vector<32x32xf32>
    %cst_11 = arith.constant dense<0.000000e+00> : vector<16x32xf32>
    %116 = tpu.matmul %114, %115, %cst_11 {dimension_numbers = #tpu.dot_dimension_numbers<[1], [0], [0], [1], [0, 0, 1, 1], [], []>} : vector<16x32xf32>, vector<32x32xf32>, vector<16x32xf32> -> vector<16x32xf32>
    %c0_12 = arith.constant 0 : index
    %c0_13 = arith.constant 0 : index
    %117 = vector.load %arg5[%c0_12, %c0_13] : memref<1x32xf32, #tpu.memory_space<vmem>>, vector<1x32xf32>
    %118 = vector.broadcast %117 : vector<1x32xf32> to vector<16x32xf32>
    %119 = arith.addf %116, %118 : vector<16x32xf32>
    %c0_14 = arith.constant 0 : index
    %c0_15 = arith.constant 0 : index
    %120 = vector.load %arg6[%c0_14, %c0_15] : memref<16x32xf32, #tpu.memory_space<vmem>>, vector<16x32xf32>
    tpu.vector_store %arg6[%c0_14, %c0_15], %119 {strides = array<i32>} : memref<16x32xf32, #tpu.memory_space<vmem>>, vector<16x32xf32>,
    return
  }
  func.func @transform_0(%arg0: i32) -> (i32, i32) {
    %c0_i32 = arith.constant 0 : i32
    %c0_i32_0 = arith.constant 0 : i32
    %c0_i32_1 = arith.constant 0 : i32
    return %c0_i32, %c0_i32_0 : i32, i32
  }
  func.func @transform_1(%arg0: i32) -> (i32, i32) {
    %c0_i32 = arith.constant 0 : i32
    %c0_i32_0 = arith.constant 0 : i32
    %c0_i32_1 = arith.constant 0 : i32
    return %c0_i32, %c0_i32_0 : i32, i32
  }
  func.func @transform_2(%arg0: i32) -> (i32, i32) {
    %c0_i32 = arith.constant 0 : i32
    %c0_i32_0 = arith.constant 0 : i32
    %c0_i32_1 = arith.constant 0 : i32
    return %c0_i32, %c0_i32_0 : i32, i32
  }
  func.func @transform_3(%arg0: i32) -> (i32, i32) {
    %c0_i32 = arith.constant 0 : i32
    %c0_i32_0 = arith.constant 0 : i32
    %c0_i32_1 = arith.constant 0 : i32
    return %c0_i32, %c0_i32_0 : i32, i32
  }
  func.func @transform_4(%arg0: i32) -> (i32, i32) {
    %c0_i32 = arith.constant 0 : i32
    %c0_i32_0 = arith.constant 0 : i32
    %c0_i32_1 = arith.constant 0 : i32
    return %c0_i32, %c0_i32_0 : i32, i32
  }
  func.func @transform_5(%arg0: i32) -> (i32, i32) {
    %c0_i32 = arith.constant 0 : i32
    %c0_i32_0 = arith.constant 0 : i32
    %c0_i32_1 = arith.constant 0 : i32
    return %c0_i32, %c0_i32_0 : i32, i32
  }
}

</mosaic_0001>

<bundles_post_ra>
// kernel: tpu_custom_call.1
= control target key start
LH: loop header
LB: loop body
LE: loop exit
PB: predicated region body
PF: predicated region fallthrough
CT: control target
= control target key end

     0   :  { %10 = vsyncpa [#allocation3], 0  ;;  %s3197_s0 = inlined_call_operand.hbm [shape: f32[16,32], index: 0, kind: input, shape index: {}]   ;;  %s3198_s1 = inlined_call_operand.hbm [shape: f32[32,96], index: 1, kind: input, shape index: {}]   ;;  %s3199_s2 = inlined_call_operand.vmem [shape: f32[1,96], index: 2, kind: input, shape index: {}]   ;;  %s3200_s3 = inlined_call_operand.hbm [shape: f32[32,32], index: 3, kind: input, shape index: {}]   ;;  %s3201_s4 = inlined_call_operand.vmem [shape: f32[1,32], index: 4, kind: input, shape index: {}]   ;;  %s3202_s5 = inlined_call_operand.hbm [shape: f32[16,32], index: 5, kind: output, shape index: {}]  }
   0x1   :  { %11 = vsyncpa [#allocation6], 0 }
   0x2   :  { %12 = vsyncpa [#allocation4], 0  ;;  %s2605_s18 = smov [#allocation5]   ;;  %s2606_s20 = smov [#allocation2]  }
   0x3   :  { %s30_s19 = sshll.u32 %s2605_s18, 4  ;;  %s18_s21 = sshll.u32 %s2606_s20, 4  ;;  %s31_s19 = int_to_ptr.vmem [resolvable:$true] %s30_s19  ;;  %s2652_s21 = int_to_ptr.vmem [resolvable:$true] %s18_s21 }
   0x4   :  { %s2511_s24 = scalar_lea.hbm %s3198_s1, 512 }
   0x5   :  { %p2512_p0 = scmp.ne.s32.totalorder %s3198_s1, %s2511_s24  ;;  %p2515_p1 = scmp.lt.u32.totalorder %s2511_s24, %s3198_s1 }
   0x7   :  { %p2517_p2 = pnand %p2515_p1, %p2512_p0 }
   0x9   :  { %2520 = shalt.err (!%p2517_p2)
}
   0xa   :  { %s2521_s29 = scalar_lea.vmem %s31_s19, 512  ;;  %p2526_p4 = scmp.lt.s32.totalorder %s31_s19, %s31_s19 }
   0xb   :  { %p2522_p3 = scmp.ne.s32.totalorder %s31_s19, %s2521_s29  ;;  %p2527_p5 = scmp.lt.s32.totalorder %s2521_s29, %s2521_s29 }
   0xd   :  { %p2528_p6 = por %p2527_p5, %p2526_p4 }
   0xf   :  { %p2529_p7 = pnand %p2528_p6, %p2522_p3 }
  0x11   :  { %2532 = shalt.err (!%p2529_p7)
}
  0x12   :  { %s2607_s30 = smov 128   ;;  %s2608_s6 = smov 8  }
  0x13   :  { %36 = dma.hbm_to_vmem [thread:$0]  %s3198_s1, 512, %s31_s19, [#allocation6], %s2607_s30, %s2607_s30, %s2608_s6  }
  0x14   :  { %s2533_s11 = scalar_lea.hbm %s3197_s0, 256 }
  0x15   :  { %p2534_p8 = scmp.ne.s32.totalorder %s3197_s0, %s2533_s11  ;;  %p2537_p9 = scmp.lt.u32.totalorder %s2533_s11, %s3197_s0 }
  0x17   :  { %p2539_p10 = pnand %p2537_p9, %p2534_p8 }
  0x19   :  { %2542 = shalt.err (!%p2539_p10)
}
  0x1a   :  { %s2543_s16 = scalar_lea.vmem %s2652_s21, 256  ;;  %p2548_p12 = scmp.lt.s32.totalorder %s2652_s21, %s2652_s21 }
  0x1b   :  { %p2544_p11 = scmp.ne.s32.totalorder %s2652_s21, %s2543_s16  ;;  %p2549_p13 = scmp.lt.s32.totalorder %s2543_s16, %s2543_s16 }
  0x1d   :  { %p2550_p0 = por %p2549_p13, %p2548_p12 }
  0x1f   :  { %p2551_p1 = pnand %p2550_p0, %p2544_p11 }
  0x21   :  { %2554 = shalt.err (!%p2551_p1)
}
  0x22   :  { %24 = dma.hbm_to_vmem [thread:$0]  %s3197_s0, 256, %s2652_s21, [#allocation3], %s2607_s30, %s2607_s30, %s2608_s6  }
  0x23   :  { %s2609_s18 = smov [#allocation7]   ;;  %s2555_s23 = scalar_lea.hbm %s3200_s3, 512 }
  0x24   :  { %s44_s19 = sshll.u32 %s2609_s18, 4  ;;  %p2556_p2 = scmp.ne.s32.totalorder %s3200_s3, %s2555_s23  ;;  %s45_s19 = int_to_ptr.vmem [resolvable:$true] %s44_s19 }
  0x25   :  { %p2559_p3 = scmp.lt.u32.totalorder %s2555_s23, %s3200_s3 }
  0x27   :  { %p2561_p4 = pnand %p2559_p3, %p2556_p2 }
  0x29   :  { %2564 = shalt.err (!%p2561_p4)
}
  0x2a   :  { %s2565_s28 = scalar_lea.vmem %s45_s19, 512  ;;  %p2570_p6 = scmp.lt.s32.totalorder %s45_s19, %s45_s19 }
  0x2b   :  { %p2566_p5 = scmp.ne.s32.totalorder %s45_s19, %s2565_s28  ;;  %p2571_p7 = scmp.lt.s32.totalorder %s2565_s28, %s2565_s28 }
  0x2d   :  { %p2572_p8 = por %p2571_p7, %p2570_p6 }
  0x2f   :  { %p2573_p9 = pnand %p2572_p8, %p2566_p5 }
  0x31   :  { %2576 = shalt.err (!%p2573_p9)
}
  0x32   :  { %50 = dma.hbm_to_vmem [thread:$0]  %s3200_s3, 512, %s45_s19, [#allocation6], %s2607_s30, %s2607_s30, %s2608_s6  }
  0x33   :  { %2599 = dma.done.wait [#allocation3], 256  }
  0x34   :  { %2600 = vsyncadd [#allocation3], 4294967040 }
  0x35   :  { %2601 = dma.done.wait [#allocation6], 1024  }
  0x36   :  { %2602 = vsyncadd [#allocation6], 4294966272  ;;  %vm75_vm0 = vcmask 261120   ;;  %v64_v0 = vld [vmem:[#allocation5] sm:$0xff]  ;;  %v65_v1 = vld [vmem:[#allocation5 + $0x8] sm:$0xff]  ;;  %v163_v10 = vlaneseq  ;;  %s2611_s7 = smov 120  }
  0x37   :  { %v66_v2 = vld [vmem:[#allocation5 + $0x10] sm:$0xff]  ;;  %v2446_v3 = vpack.c.bf16 %v65_v1, %v64_v0  ;;  %v67_v4 = vld [vmem:[#allocation5 + $0x18] sm:$0xff]  ;;  %v2610_v8 = vmov 1983009808   ;;  %vm337_vm1 = vcmask 1041409   ;;  %vm339_vm2 = vcmask 1042434  }
  0x38   :  { %v62_v5 = vld [vmem:[#allocation2] sm:$0xff]  ;;  %v2450_v6 = vpack.c.bf16 %v67_v4, %v66_v2  ;;  %v63_v7 = vld [vmem:[#allocation2 + $0x8] sm:$0xff]  ;;  %v161_v9 = vunpack.c.l.s4 %v2610_v8  ;;  %v2706_v12 = vshrl.u32 %v163_v10, 7  ;;  %vm341_vm3 = vcmask 1043459   ;;  %s2613_s8 = smov 104   ;;  %s2616_s9 = smov 96  }
  0x39   :  { %2352 = vmatprep.mubr.msk.f32.mxu0 %vm75_vm0, %v62_v5  ;;  %2447 = vmatprep.subr.bf16.mxu0 %v2446_v3  ;;  %v2270_v13 = vld [vmem:[%s3199_s2] ss:$0 sm:$0xff]  ;;  %s2612_s2 = smov 112   ;;  %vm343_vm4 = vcmask 1044484   ;;  %vm345_vm5 = vcmask 1045509   ;;  %vm347_vm6 = vcmask 1046534  }
  0x3a   :  { %2449 = vmatpush3.bf16.msra.mxu0 %v2446_v3  ;;  %v162_v11 = vunpack.c.0.s8 %v161_v9  ;;  %v2728_v27 = vsub.s32 0, %v2706_v12  ;;  %vm349_vm7 = vcmask 1047559   ;;  %v2614_v8 = vmov 0.0   ;;  %s2617_s10 = smov 64   ;;  %s2618_s11 = smov 16  }
  0x3b   :  { %2451 = vmatprep.subr.bf16.mxu0 %v2450_v6  ;;  %2355 = vmatprep.subr.mxu1 %v2614_v8  ;;  %vm2615_vm8 = vmmov 0   ;;  %vm353_vm9 = vcmask 64512   ;;  %s2619_s12 = smov 24   ;;  %vm1942_vm10 = vcmask 130048   ;;  %vm1944_vm11 = vcmask 195584   ;;  %s2621_s15 = smov [#allocation8]  }
  0x3c   :  { %v2712_v14 = vsub.s32 %v162_v11, %v2706_v12  ;;  %2357 = vmatprep.mubr.msk.f32.mxu1 %vm2615_vm8, %v2614_v8  ;;  %vm2109_vm12 = vcmask 1040384   ;;  %s2257_s16 = sshll.u32 %s2621_s15, 4  ;;  %s2258_s16 = int_to_ptr.vmem [resolvable:$true] %s2257_s16 }
  0x3d   :  { %s2577_s1 = scalar_lea.vmem %s2258_s16, 256  ;;  %p2582_p11 = scmp.lt.s32.totalorder %s2258_s16, %s2258_s16 }
  0x3e   :  { %2453 = vmatpush3.bf16.msra.mxu0 %v2450_v6  ;;  %p2578_p10 = scmp.ne.s32.totalorder %s2258_s16, %s2577_s1  ;;  %p2583_p12 = scmp.lt.s32.totalorder %s2577_s1, %s2577_s1 }
  0x3f   :  { %2375 = vmatprep.subr.mxu0 %v2614_v8 }
  0x40   :  { %p2584_p13 = por %p2583_p12, %p2582_p11 }
  0x41   :  { %2353 = vmatmul.mubr.msk.f32.vlgmr.msra.gmra.mrb[0].mxu0 %vm75_vm0, %v63_v7 }
  0x42   :  { %2377 = vmatprep.mubr.msk.f32.mxu0 %vm2615_vm8, %v2614_v8  ;;  %p2585_p0 = pnand %p2584_p13, %p2578_p10 }
 0x114   :  { %v2354_v15 = vpop.f32.mrb[0].mxu0 }
 0x115   :  { %v154_v16 = vadd.f32 %v2354_v15, %v2270_v13  ;;  %v148_v17 = vpop.f32.mrb[1].mxu0 }
 0x116   :  { %v149_v18 = vadd.f32 %v2270_v13, %v148_v17 }
 0x117   :  { %v183_v19 = vrot.slane %v154_v16, %v2712_v14  ;;  %v176_v22 = vcombine.high %v154_v16, %v154_v16 }
 0x118   :  { %v159_v20 = vcombine.high %v149_v18, %v149_v18  ;;  %v2716_v21 = vrot.slane %v149_v18, %v2712_v14 }
 0x119   :  { %201 = vrot.lane.b32.xlu0 %v183_v19, %s2611_s7  ;;  %v191_v23 = vcombine.high %v183_v19, %v183_v19  ;;  %v249_v28 = vrot.slane %v183_v19, 7  ;;  %v2738_v32 = vrot.slane %v176_v22, %v2712_v14  ;;  %v324_v50 = vrot.slane %v183_v19, %v2728_v27 }
 0x11a   :  { %v2720_v24 = vrot.slane %v159_v20, %v2712_v14  ;;  %v2724_v25 = vcombine.high %v2716_v21, %v2716_v21  ;;  %v241_v26 = vrot.slane %v2716_v21, 7  ;;  %v308_v39 = vrot.slane %v2716_v21, %v2728_v27 }
 0x11b   :  { %203 = vrot.lane.b32.xlu1 %v191_v23, %s2611_s7  ;;  %v251_v34 = vrot.slane %v191_v23, 7  ;;  %v250_v42 = vrot.slane %v249_v28, 2  ;;  %v192_v46 = vcombine.high %v2738_v32, %v2738_v32  ;;  %v328_v53 = vrot.slane %v191_v23, %v2728_v27 }
 0x11c   :  { %v2733_v29 = vcombine.high %v2720_v24, %v2720_v24  ;;  %v243_v30 = vrot.slane %v2724_v25, 7  ;;  %v245_v31 = vrot.slane %v2720_v24, 7  ;;  %v2741_v33 = vrot.slane %v241_v26, 2 }
 0x11d   :  { %217 = vrot.lane.b32.xlu0 %v183_v19, %s2612_s2  ;;  %v312_v35 = vrot.slane %v2724_v25, %v2728_v27  ;;  %v316_v40 = vrot.slane %v2720_v24, %v2728_v27  ;;  %v252_v48 = vrot.slane %v251_v34, 2  ;;  %v332_v56 = vrot.slane %v2738_v32, %v2728_v27 }
 0x11e   :  { %v2745_v36 = vrot.slane %v243_v30, 2  ;;  %v2747_v37 = vrot.slane %v245_v31, 2  ;;  %v247_v38 = vrot.slane %v2733_v29, 7  ;;  %v320_v41 = vrot.slane %v2733_v29, %v2728_v27 }
 0x11f   :  { %219 = vrot.lane.b32.xlu1 %v191_v23, %s2612_s2  ;;  %v776_v47 = vrot.slane %v2741_v33, %v2728_v27  ;;  %v338_v49 = vsel %vm337_vm1, %v312_v35, %v308_v39  ;;  %v792_v58 = vrot.slane %v250_v42, %v2728_v27  ;;  %v336_v60 = vrot.slane %v192_v46, %v2728_v27 }
 0x120   :  { %v780_v43 = vrot.slane %v2745_v36, %v2728_v27  ;;  %v784_v44 = vrot.slane %v2747_v37, %v2728_v27  ;;  %v2761_v45 = vrot.slane %v247_v38, 2  ;;  %v340_v51 = vsel %vm339_vm2, %v316_v40, %v338_v49 }
 0x121   :  { %233 = vrot.lane.b32.xlu0 %v183_v19, %s2613_s8  ;;  %v342_v54 = vsel %vm341_vm3, %v320_v41, %v340_v51  ;;  %v796_v62 = vrot.slane %v252_v48, %v2728_v27  ;;  %v253_v4 = vrot.slane %v2738_v32, 7  ;;  %v255_v6 = vrot.slane %v192_v46, 7 }
 0x122   :  { %v788_v52 = vrot.slane %v2761_v45, %v2728_v27  ;;  %v805_v55 = vsel %vm337_vm1, %v780_v43, %v776_v47  ;;  %v344_v57 = vsel %vm343_vm4, %v324_v50, %v342_v54 }
 0x123   :  { %235 = vrot.lane.b32.xlu1 %v191_v23, %s2613_s8  ;;  %v806_v59 = vsel %vm339_vm2, %v784_v44, %v805_v55  ;;  %v346_v61 = vsel %vm345_vm5, %v328_v53, %v344_v57  ;;  %v2838_v5 = vrot.slane %v253_v4, 2  ;;  %v2856_v7 = vrot.slane %v255_v6, 2 }
 0x124   :  { %v807_v63 = vsel %vm341_vm3, %v788_v52, %v806_v59  ;;  %v348_v0 = vsel %vm347_vm6, %v332_v56, %v346_v61 }
 0x125   :  { %193 = vrot.lane.b32.xlu0 %v2716_v21, %s2611_s7  ;;  %v808_v1 = vsel %vm343_vm4, %v792_v58, %v807_v63  ;;  %v2793_v2 = vsel %vm349_vm7, %v336_v60, %v348_v0 }
 0x126   :  { %v2796_v3 = vsel %vm345_vm5, %v796_v62, %v808_v1 }
 0x127   :  { %197 = vrot.lane.b32.xlu1 %v2720_v24, %s2611_s7 }
 0x129   :  { %209 = vrot.lane.b32.xlu0 %v2716_v21, %s2612_s2 }
 0x12b   :  { %211 = vrot.lane.b32.xlu1 %v2724_v25, %s2612_s2 }
 0x12d   :  { %225 = vrot.lane.b32.xlu0 %v2716_v21, %s2613_s8 }
 0x12f   :  { %213 = vrot.lane.b32.xlu1 %v2720_v24, %s2612_s2 }
 0x131   :  { %205 = vrot.lane.b32.xlu0 %v2738_v32, %s2611_s7 }
 0x133   :  { %227 = vrot.lane.b32.xlu1 %v2724_v25, %s2613_s8 }
 0x135   :  { %221 = vrot.lane.b32.xlu0 %v2738_v32, %s2612_s2 }
 0x137   :  { %229 = vrot.lane.b32.xlu1 %v2720_v24, %s2613_s8 }
 0x139   :  { %237 = vrot.lane.b32.xlu0 %v2738_v32, %s2613_s8 }
 0x13b   :  { %281 = vrot.lane.b32.xlu1 %v250_v42, %s2612_s2 }
 0x13d   :  { %195 = vrot.lane.b32.xlu0 %v2724_v25, %s2611_s7 }
 0x13f   :  { %199 = vrot.lane.b32.xlu1 %v2733_v29, %s2611_s7 }
 0x141   :  { %207 = vrot.lane.b32.xlu0 %v192_v46, %s2611_s7 }
 0x143   :  { %215 = vrot.lane.b32.xlu1 %v2733_v29, %s2612_s2 }
 0x145   :  { %223 = vrot.lane.b32.xlu0 %v192_v46, %s2612_s2 }
 0x147   :  { %231 = vrot.lane.b32.xlu1 %v2733_v29, %s2613_s8 }
 0x149   :  { %239 = vrot.lane.b32.xlu0 %v192_v46, %s2613_s8 }
 0x14b   :  { %273 = vrot.lane.b32.xlu1 %v2741_v33, %s2612_s2 }
 0x14d   :  { %265 = vrot.lane.b32.xlu0 %v250_v42, %s2611_s7 }
 0x14f   :  { %289 = vrot.lane.b32.xlu1 %v2741_v33, %s2613_s8 }
 0x151   :  { %297 = vrot.lane.b32.xlu0 %v250_v42, %s2613_s8 }
 0x153   :  { %267 = vrot.lane.b32.xlu1 %v252_v48, %s2611_s7 }
 0x155   :  { %257 = vrot.lane.b32.xlu0 %v2741_v33, %s2611_s7 }
 0x157   :  { %269 = vrot.lane.b32.xlu1 %v2838_v5, %s2611_s7 }
 0x159   :  { %299 = vrot.lane.b32.xlu0 %v252_v48, %s2613_s8 }
 0x15b   :  { %283 = vrot.lane.b32.xlu1 %v252_v48, %s2612_s2 }
 0x15d   :  { %275 = vrot.lane.b32.xlu0 %v2745_v36, %s2612_s2 }
 0x15f   :  { %285 = vrot.lane.b32.xlu1 %v2838_v5, %s2612_s2 }
 0x161   :  { %277 = vrot.lane.b32.xlu0 %v2747_v37, %s2612_s2 }
 0x163   :  { %259 = vrot.lane.b32.xlu1 %v2745_v36, %s2611_s7 }
 0x165   :  { %291 = vrot.lane.b32.xlu0 %v2745_v36, %s2613_s8 }
 0x167   :  { %261 = vrot.lane.b32.xlu1 %v2747_v37, %s2611_s7 }
 0x169   :  { %271 = vrot.lane.b32.xlu0 %v2856_v7, %s2611_s7 }
 0x16b   :  { %293 = vrot.lane.b32.xlu1 %v2747_v37, %s2613_s8 }
 0x16d   :  { %279 = vrot.lane.b32.xlu0 %v2761_v45, %s2612_s2 }
 0x16f   :  { %263 = vrot.lane.b32.xlu1 %v2761_v45, %s2611_s7 }
 0x171   :  { %295 = vrot.lane.b32.xlu0 %v2761_v45, %s2613_s8 }
 0x173   :  { %287 = vrot.lane.b32.xlu1 %v2856_v7, %s2612_s2 }
 0x175   :  { %301 = vrot.lane.b32.xlu0 %v2838_v5, %s2613_s8 }
 0x177   :  { %303 = vrot.lane.b32.xlu1 %v2856_v7, %s2613_s8 }
 0x179   :  { %351 = vrot.lane.b32.xlu0 %v2793_v2, %s2616_s9 }
 0x18b   :  { %v202_v9 = vpop.permute.xlu0 %201 }
 0x18c   :  { %v447_v38 = vrot.slane %v202_v9, %v2728_v27 }
 0x18d   :  { %v204_v10 = vpop.permute.xlu1 %203 }
 0x18e   :  { %v451_v43 = vrot.slane %v204_v10, %v2728_v27 }
 0x18f   :  { %v218_v11 = vpop.permute.xlu0 %217 }
 0x190   :  { %v562_v53 = vrot.slane %v218_v11, %v2728_v27 }
 0x191   :  { %v220_v13 = vpop.permute.xlu1 %219 }
 0x192   :  { %v566_v58 = vrot.slane %v220_v13, %v2728_v27 }
 0x193   :  { %v2882_v15 = vpop.permute.xlu0 %233 }
 0x194   :  { %v677_v10 = vrot.slane %v2882_v15, %v2728_v27 }
 0x195   :  { %v2884_v16 = vpop.permute.xlu1 %235 }
 0x197   :  { %v194_v17 = vpop.permute.xlu0 %193 }
 0x198   :  { %v431_v31 = vrot.slane %v194_v17, %v2728_v27 }
 0x199   :  { %v198_v18 = vpop.permute.xlu1 %197 }
 0x19a   :  { %v439_v33 = vrot.slane %v198_v18, %v2728_v27  ;;  %v800_v18 = vrot.slane %v2838_v5, %v2728_v27 }
 0x19b   :  { %v210_v19 = vpop.permute.xlu0 %209 }
 0x19c   :  { %v546_v39 = vrot.slane %v210_v19, %v2728_v27  ;;  %v681_v19 = vrot.slane %v2884_v16, %v2728_v27 }
 0x19d   :  { %v212_v20 = vpop.permute.xlu1 %211 }
 0x19e   :  { %v550_v34 = vrot.slane %v212_v20, %v2728_v27 }
 0x19f   :  { %v226_v21 = vpop.permute.xlu0 %225 }
 0x1a0   :  { %v575_v45 = vsel %vm337_vm1, %v550_v34, %v546_v39  ;;  %v661_v59 = vrot.slane %v226_v21, %v2728_v27 }
 0x1a1   :  { %v214_v22 = vpop.permute.xlu1 %213 }
 0x1a2   :  { %v554_v40 = vrot.slane %v214_v22, %v2728_v27 }
 0x1a3   :  { %v206_v23 = vpop.permute.xlu0 %205 }
 0x1a4   :  { %v455_v46 = vrot.slane %v206_v23, %v2728_v27  ;;  %v576_v54 = vsel %vm339_vm2, %v554_v40, %v575_v45 }
 0x1a5   :  { %v228_v24 = vpop.permute.xlu1 %227 }
 0x1a6   :  { %v665_v49 = vrot.slane %v228_v24, %v2728_v27  ;;  %v810_v24 = vsel %vm347_vm6, %v800_v18, %v2796_v3 }
 0x1a7   :  { %v222_v25 = vpop.permute.xlu0 %221 }
 0x1a8   :  { %v570_v62 = vrot.slane %v222_v25, %v2728_v27  ;;  %v690_v1 = vsel %vm337_vm1, %v665_v49, %v661_v59  ;;  %v804_v25 = vrot.slane %v2856_v7, %v2728_v27 }
 0x1a9   :  { %v230_v26 = vpop.permute.xlu1 %229 }
 0x1aa   :  { %v669_v55 = vrot.slane %v230_v26, %v2728_v27 }
 0x1ab   :  { %v238_v28 = vpop.permute.xlu0 %237 }
 0x1ac   :  { %v691_v11 = vsel %vm339_vm2, %v669_v55, %v690_v1  ;;  %v685_v22 = vrot.slane %v238_v28, %v2728_v27 }
 0x1ad   :  { %v2886_v29 = vpop.permute.xlu1 %281 }
 0x1ae   :  { %v1022_v49 = vrot.slane %v2886_v29, %v2728_v27 }
 0x1af   :  { %v196_v30 = vpop.permute.xlu0 %195 }
 0x1b0   :  { %v435_v32 = vrot.slane %v196_v30, %v2728_v27 }
 0x1b1   :  { %v200_v35 = vpop.permute.xlu1 %199 }
 0x1b2   :  { %v460_v36 = vsel %vm337_vm1, %v435_v32, %v431_v31  ;;  %v443_v37 = vrot.slane %v200_v35, %v2728_v27  ;;  %v2952_v31 = vsel %vm349_vm7, %v804_v25, %v810_v24 }
 0x1b3   :  { %v461_v41 = vsel %vm339_vm2, %v439_v33, %v460_v36  ;;  %v208_v42 = vpop.permute.xlu0 %207 }
 0x1b4   :  { %v462_v44 = vsel %vm341_vm3, %v443_v37, %v461_v41  ;;  %v459_v50 = vrot.slane %v208_v42, %v2728_v27 }
 0x1b5   :  { %v463_v47 = vsel %vm343_vm4, %v447_v38, %v462_v44  ;;  %v216_v48 = vpop.permute.xlu1 %215 }
 0x1b6   :  { %v558_v51 = vrot.slane %v216_v48, %v2728_v27  ;;  %v464_v52 = vsel %vm345_vm5, %v451_v43, %v463_v47 }
 0x1b7   :  { %v224_v56 = vpop.permute.xlu0 %223  ;;  %v465_v57 = vsel %vm347_vm6, %v455_v46, %v464_v52 }
 0x1b8   :  { %v577_v60 = vsel %vm341_vm3, %v558_v51, %v576_v54  ;;  %v2915_v61 = vsel %vm349_vm7, %v459_v50, %v465_v57  ;;  %v574_v4 = vrot.slane %v224_v56, %v2728_v27 }
 0x1b9   :  { %v578_v63 = vsel %vm343_vm4, %v562_v53, %v577_v60  ;;  %v232_v0 = vpop.permute.xlu1 %231  ;;  %467 = vrot.lane.b32.xlu1 %v2915_v61, %s2616_s9 }
 0x1ba   :  { %v673_v6 = vrot.slane %v232_v0, %v2728_v27  ;;  %v579_v9 = vsel %vm345_vm5, %v566_v58, %v578_v63 }
 0x1bb   :  { %v240_v13 = vpop.permute.xlu0 %239  ;;  %v580_v17 = vsel %vm347_vm6, %v570_v62, %v579_v9 }
 0x1bc   :  { %v692_v20 = vsel %vm341_vm3, %v673_v6, %v691_v11  ;;  %v2935_v21 = vsel %vm349_vm7, %v574_v4, %v580_v17  ;;  %v689_v5 = vrot.slane %v240_v13, %v2728_v27 }
 0x1bd   :  { %v693_v15 = vsel %vm343_vm4, %v677_v10, %v692_v20  ;;  %v274_v23 = vpop.permute.xlu1 %273  ;;  %582 = vrot.lane.b32.xlu0 %v2935_v21, %s2616_s9 }
 0x1be   :  { %v694_v16 = vsel %vm345_vm5, %v681_v19, %v693_v15  ;;  %v1006_v47 = vrot.slane %v274_v23, %v2728_v27 }
 0x1bf   :  { %v266_v26 = vpop.permute.xlu0 %265  ;;  %v695_v30 = vsel %vm347_vm6, %v685_v22, %v694_v16 }
 0x1c0   :  { %v2949_v28 = vsel %vm349_vm7, %v689_v5, %v695_v30  ;;  %v907_v50 = vrot.slane %v266_v26, %v2728_v27 }
 0x1c1   :  { %v290_v32 = vpop.permute.xlu1 %289  ;;  %697 = vrot.lane.b32.xlu1 %v2949_v28, %s2616_s9  ;;  %812 = vrot.lane.b32.xlu0 %v2952_v31, %s2616_s9 }
 0x1c2   :  { %v1121_v57 = vrot.slane %v290_v32, %v2728_v27 }
 0x1c3   :  { %v298_v3 = vpop.permute.xlu0 %297 }
 0x1c4   :  { %v1137_v58 = vrot.slane %v298_v3, %v2728_v27 }
 0x1c5   :  { %v268_v33 = vpop.permute.xlu1 %267 }
 0x1c6   :  { %v911_v4 = vrot.slane %v268_v33, %v2728_v27 }
 0x1c7   :  { %v258_v34 = vpop.permute.xlu0 %257 }
 0x1c8   :  { %v891_v53 = vrot.slane %v258_v34, %v2728_v27 }
 0x1c9   :  { %v270_v7 = vpop.permute.xlu1 %269 }
 0x1ca   :  { %v915_v6 = vrot.slane %v270_v7, %v2728_v27 }
 0x1cb   :  { %v300_v35 = vpop.permute.xlu0 %299 }
 0x1cc   :  { %v1141_v20 = vrot.slane %v300_v35, %v2728_v27 }
 0x1cd   :  { %v284_v36 = vpop.permute.xlu1 %283 }
 0x1ce   :  { %v1026_v62 = vrot.slane %v284_v36, %v2728_v27 }
 0x1cf   :  { %v276_v37 = vpop.permute.xlu0 %275 }
 0x1d0   :  { %v1010_v44 = vrot.slane %v276_v37, %v2728_v27 }
 0x1d1   :  { %v286_v38 = vpop.permute.xlu1 %285 }
 0x1d2   :  { %v1035_v54 = vsel %vm337_vm1, %v1010_v44, %v1006_v47  ;;  %v1030_v22 = vrot.slane %v286_v38, %v2728_v27 }
 0x1d3   :  { %v278_v39 = vpop.permute.xlu0 %277 }
 0x1d4   :  { %v1014_v45 = vrot.slane %v278_v39, %v2728_v27 }
 0x1d5   :  { %v260_v40 = vpop.permute.xlu1 %259 }
 0x1d6   :  { %v895_v48 = vrot.slane %v260_v40, %v2728_v27  ;;  %v1036_v59 = vsel %vm339_vm2, %v1014_v45, %v1035_v54 }
 0x1d7   :  { %v292_v41 = vpop.permute.xlu0 %291 }
 0x1d8   :  { %v1125_v55 = vrot.slane %v292_v41, %v2728_v27  ;;  %v920_v63 = vsel %vm337_vm1, %v895_v48, %v891_v53 }
 0x1d9   :  { %v262_v42 = vpop.permute.xlu1 %261 }
 0x1da   :  { %v899_v51 = vrot.slane %v262_v42, %v2728_v27  ;;  %v1150_v13 = vsel %vm337_vm1, %v1125_v55, %v1121_v57 }
 0x1db   :  { %v272_v43 = vpop.permute.xlu0 %271 }
 0x1dc   :  { %v921_v9 = vsel %vm339_vm2, %v899_v51, %v920_v63  ;;  %v919_v5 = vrot.slane %v272_v43, %v2728_v27 }
 0x1dd   :  { %v294_v46 = vpop.permute.xlu1 %293 }
 0x1de   :  { %v1129_v29 = vrot.slane %v294_v46, %v2728_v27 }
 0x1df   :  { %v280_v52 = vpop.permute.xlu0 %279 }
 0x1e0   :  { %v1018_v56 = vrot.slane %v280_v52, %v2728_v27  ;;  %v1151_v15 = vsel %vm339_vm2, %v1129_v29, %v1150_v13 }
 0x1e1   :  { %v264_v60 = vpop.permute.xlu1 %263 }
 0x1e2   :  { %v1037_v0 = vsel %vm341_vm3, %v1018_v56, %v1036_v59  ;;  %v903_v1 = vrot.slane %v264_v60, %v2728_v27 }
 0x1e3   :  { %v1038_v10 = vsel %vm343_vm4, %v1022_v49, %v1037_v0  ;;  %v296_v11 = vpop.permute.xlu0 %295 }
 0x1e4   :  { %v922_v17 = vsel %vm341_vm3, %v903_v1, %v921_v9  ;;  %v1133_v18 = vrot.slane %v296_v11, %v2728_v27  ;;  %v1039_v19 = vsel %vm345_vm5, %v1026_v62, %v1038_v10 }
 0x1e5   :  { %v923_v23 = vsel %vm343_vm4, %v907_v50, %v922_v17  ;;  %v288_v24 = vpop.permute.xlu1 %287  ;;  %v1040_v33 = vsel %vm347_vm6, %v1030_v22, %v1039_v19 }
 0x1e6   :  { %v1152_v16 = vsel %vm341_vm3, %v1133_v18, %v1151_v15  ;;  %v1034_v25 = vrot.slane %v288_v24, %v2728_v27  ;;  %v924_v26 = vsel %vm345_vm5, %v911_v4, %v923_v23 }
 0x1e7   :  { %v1153_v30 = vsel %vm343_vm4, %v1137_v58, %v1152_v16  ;;  %v302_v32 = vpop.permute.xlu0 %301  ;;  %v925_v3 = vsel %vm347_vm6, %v915_v6, %v924_v26 }
 0x1e8   :  { %v1145_v34 = vrot.slane %v302_v32, %v2728_v27  ;;  %v2999_v7 = vsel %vm349_vm7, %v919_v5, %v925_v3  ;;  %v3002_v35 = vsel %vm349_vm7, %v1034_v25, %v1040_v33  ;;  %v1154_v36 = vsel %vm345_vm5, %v1141_v20, %v1153_v30 }
 0x1e9   :  { %927 = vrot.lane.b32.xlu1 %v2999_v7, %s2616_s9  ;;  %v304_v37 = vpop.permute.xlu1 %303  ;;  %1042 = vrot.lane.b32.xlu0 %v3002_v35, %s2616_s9 }
 0x1ea   :  { %v1149_v38 = vrot.slane %v304_v37, %v2728_v27  ;;  %v1155_v39 = vsel %vm347_vm6, %v1145_v34, %v1154_v36 }
 0x1eb   :  { %v352_v40 = vpop.permute.xlu0 %351 }
 0x1ec   :  { %2356 = vmatpush3.xpose.msk.msra.mxu1 %vm353_vm9, %v352_v40  ;;  %v3013_v41 = vsel %vm349_vm7, %v1149_v38, %v1155_v39 }
 0x1ed   :  { %1157 = vrot.lane.b32.xlu1 %v3013_v41, %s2616_s9  ;;  %2360 = vmatprep.subr.mxu1 %v2614_v8 }
 0x1ef   :  { %2358 = vmatmul.mubr.msk.f32.vlgmr.msra.gmra.mrb[0].mxu1 %vm353_vm9, %v2793_v2 }
 0x1f0   :  { %2362 = vmatprep.mubr.msk.f32.mxu1 %vm2615_vm8, %v2614_v8 }
 0x22b   :  { %v468_v42 = vpop.permute.xlu1 %467 }
 0x22c   :  { %2361 = vmatpush3.xpose.msk.msra.mxu1 %vm353_vm9, %v468_v42 }
 0x22d   :  { %2365 = vmatprep.subr.mxu1 %v2614_v8 }
 0x22f   :  { %v583_v43 = vpop.permute.xlu0 %582  ;;  %2363 = vmatmul.mubr.msk.f32.vlgmr.msra.gmra.mrb[2].mxu1 %vm353_vm9, %v2915_v61 }
 0x230   :  { %2366 = vmatpush3.xpose.msk.msra.mxu1 %vm353_vm9, %v583_v43  ;;  %2367 = vmatprep.mubr.msk.f32.mxu1 %vm2615_vm8, %v2614_v8 }
 0x231   :  { %2370 = vmatprep.subr.mxu1 %v2614_v8 }
 0x233   :  { %2368 = vmatmul.mubr.msk.f32.vlgmr.msra.gmra.mrb[4].mxu1 %vm353_vm9, %v2935_v21  ;;  %v698_v44 = vpop.permute.xlu1 %697  ;;  %v813_v45 = vpop.permute.xlu0 %812 }
 0x234   :  { %2371 = vmatpush3.xpose.msk.msra.mxu1 %vm353_vm9, %v698_v44  ;;  %2376 = vmatpush3.xpose.msk.msra.mxu0 %vm353_vm9, %v813_v45 }
 0x235   :  { %2372 = vmatprep.mubr.msk.f32.mxu1 %vm2615_vm8, %v2614_v8  ;;  %2380 = vmatprep.subr.mxu1 %v2614_v8 }
 0x236   :  { %2385 = vmatprep.subr.mxu0 %v2614_v8 }
 0x237   :  { %2373 = vmatmul.mubr.msk.f32.vlgmr.msra.gmra.mrb[6].mxu1 %vm353_vm9, %v2949_v28  ;;  %2378 = vmatmul.mubr.msk.f32.vlgmr.msra.gmra.mrb[2].mxu0 %vm353_vm9, %v2952_v31 }
 0x238   :  { %2382 = vmatprep.mubr.msk.f32.mxu1 %vm2615_vm8, %v2614_v8  ;;  %2387 = vmatprep.mubr.msk.f32.mxu0 %vm2615_vm8, %v2614_v8 }
 0x25b   :  { %v928_v46 = vpop.permute.xlu1 %927  ;;  %v1043_v47 = vpop.permute.xlu0 %1042 }
 0x25c   :  { %2381 = vmatpush3.xpose.msk.msra.mxu1 %vm353_vm9, %v928_v46  ;;  %2386 = vmatpush3.xpose.msk.msra.mxu0 %vm353_vm9, %v1043_v47 }
 0x25d   :  { %2390 = vmatprep.subr.mxu1 %v2614_v8  ;;  %2395 = vmatprep.subr.mxu0 %v2614_v8 }
 0x25f   :  { %2383 = vmatmul.mubr.msk.f32.vlgmr.msra.gmra.mrb[8].mxu1 %vm353_vm9, %v2999_v7  ;;  %v1158_v48 = vpop.permute.xlu1 %1157  ;;  %2388 = vmatmul.mubr.msk.f32.vlgmr.msra.gmra.mrb[4].mxu0 %vm353_vm9, %v3002_v35 }
 0x260   :  { %2391 = vmatpush3.xpose.msk.msra.mxu1 %vm353_vm9, %v1158_v48  ;;  %2392 = vmatprep.mubr.msk.f32.mxu1 %vm2615_vm8, %v2614_v8 }
 0x261   :  { %2400 = vmatprep.subr.mxu1 %v2614_v8  ;;  %2397 = vmatprep.mubr.msk.f32.mxu0 %vm2615_vm8, %v2614_v8 }
 0x263   :  { %2393 = vmatmul.mubr.msk.f32.vlgmr.msra.gmra.mrb[10].mxu1 %vm353_vm9, %v3013_v41 }
 0x264   :  { %2402 = vmatprep.mubr.msk.f32.mxu1 %vm2615_vm8, %v2614_v8 }
 0x2c2   :  { %v424_v49 = vpop.f32.mrb[0].mxu1 }
 0x2c3   :  { %v2359_v50 = vpop.f32.mrb[1].mxu1  ;;  %v1233_v51 = vsel %vm353_vm9, %v424_v49, -inf }
 0x2c4   :  { %1234 = vmax.xlane.f32.xlu0 %v1233_v51 }
 0x302   :  { %v539_v52 = vpop.f32.mrb[2].mxu1 }
 0x303   :  { %v2364_v53 = vpop.f32.mrb[3].mxu1  ;;  %v1236_v54 = vsel %vm353_vm9, %v539_v52, -inf }
 0x304   :  { %1237 = vmax.xlane.f32.xlu1 %v1236_v54 }
 0x306   :  { %v654_v55 = vpop.f32.mrb[4].mxu1 }
 0x307   :  { %v2369_v56 = vpop.f32.mrb[5].mxu1  ;;  %v1239_v57 = vsel %vm353_vm9, %v654_v55, -inf }
 0x308   :  { %1240 = vmax.xlane.f32.xlu0 %v1239_v57 }
 0x30a   :  { %v769_v58 = vpop.f32.mrb[6].mxu1  ;;  %v884_v59 = vpop.f32.mrb[2].mxu0 }
 0x30b   :  { %v2374_v29 = vpop.f32.mrb[7].mxu1  ;;  %v2379_v60 = vpop.f32.mrb[3].mxu0  ;;  %v1242_v62 = vsel %vm353_vm9, %v769_v58, -inf  ;;  %v1245_v63 = vsel %vm353_vm9, %v884_v59, -inf }
 0x30c   :  { %1243 = vmax.xlane.f32.xlu0 %v1242_v62  ;;  %1246 = vmax.xlane.f32.xlu1 %v1245_v63 }
 0x332   :  { %v999_v0 = vpop.f32.mrb[8].mxu1  ;;  %v1114_v1 = vpop.f32.mrb[4].mxu0 }
 0x333   :  { %v2384_v4 = vpop.f32.mrb[9].mxu1  ;;  %v2389_v6 = vpop.f32.mrb[5].mxu0  ;;  %v1248_v9 = vsel %vm353_vm9, %v999_v0, -inf  ;;  %v1251_v10 = vsel %vm353_vm9, %v1114_v1, -inf }
 0x334   :  { %1249 = vmax.xlane.f32.xlu0 %v1248_v9  ;;  %1252 = vmax.xlane.f32.xlu1 %v1251_v10 }
 0x336   :  { %v1229_v11 = vpop.f32.mrb[10].mxu1 }
 0x337   :  { %v2394_v13 = vpop.f32.mrb[11].mxu1  ;;  %v1254_v17 = vsel %vm353_vm9, %v1229_v11, -inf }
 0x338   :  { %1255 = vmax.xlane.f32.xlu0 %v1254_v17 }
 0x345   :  { %1321 = vrot.lane.b32.xlu1 %v2793_v2, %s2617_s10 }
 0x349   :  { %1473 = vrot.lane.b32.xlu1 %v2935_v21, %s2617_s10 }
 0x34d   :  { %1549 = vrot.lane.b32.xlu1 %v2949_v28, %s2617_s10 }
 0x34e   :  { %1397 = vrot.lane.b32.xlu0 %v2915_v61, %s2617_s10 }
 0x351   :  { %1701 = vrot.lane.b32.xlu1 %v2999_v7, %s2617_s10  ;;  %v1235_v18 = vpop.xlane.xlu0 %1234 }
 0x352   :  { %1625 = vrot.lane.b32.xlu0 %v2952_v31, %s2617_s10  ;;  %v1257_v19 = vsub.f32 %v424_v49, %v1235_v18 }
 0x354   :  { %v1265_v20 = vmul.f32 1.442695, %v1257_v19 }
 0x356   :  { %2479 = vpow2.f32 %v1265_v20 }
 0x360   :  { %v3084_v2 = vpop.eup %2479 }
 0x361   :  { %v1281_v21 = vsel %vm353_vm9, %v3084_v2, 0.0 }
 0x375   :  { %1282 = vadd.xlane.f32.xlu1 %v1281_v21 }
 0x391   :  { %v1238_v28 = vpop.xlane.xlu1 %1237 }
 0x392   :  { %v1258_v22 = vsub.f32 %v539_v52, %v1238_v28 }
 0x394   :  { %v1267_v15 = vmul.f32 1.442695, %v1258_v22 }
 0x395   :  { %v1241_v61 = vpop.xlane.xlu0 %1240 }
 0x396   :  { %2481 = vpow2.f32 %v1267_v15  ;;  %v1259_v23 = vsub.f32 %v654_v55, %v1241_v61 }
 0x398   :  { %v1269_v25 = vmul.f32 1.442695, %v1259_v23 }
 0x399   :  { %v1247_v24 = vpop.xlane.xlu1 %1246  ;;  %v1244_v5 = vpop.xlane.xlu0 %1243 }
 0x39a   :  { %v1261_v16 = vsub.f32 %v884_v59, %v1247_v24  ;;  %v1260_v31 = vsub.f32 %v769_v58, %v1244_v5 }
 0x39c   :  { %v1273_v26 = vmul.f32 1.442695, %v1261_v16  ;;  %v1271_v30 = vmul.f32 1.442695, %v1260_v31 }
 0x39e   :  { %2483 = vpow2.f32 %v1273_v26 }
 0x39f   :  { %2485 = vpow2.f32 %v1271_v30 }
 0x3a0   :  { %v2482_v32 = vpop.eup %2481  ;;  %2487 = vpow2.f32 %v1269_v25 }
 0x3a1   :  { %v1284_v3 = vsel %vm353_vm9, %v2482_v32, 0.0 }
 0x3a2   :  { %1285 = vadd.xlane.f32.xlu0 %v1284_v3 }
 0x3a8   :  { %v3089_v33 = vpop.eup %2483 }
 0x3a9   :  { %v3091_v34 = vpop.eup %2485  ;;  %v1293_v7 = vsel %vm353_vm9, %v3089_v33, 0.0 }
 0x3aa   :  { %v3095_v36 = vpop.eup %2487  ;;  %1294 = vadd.xlane.f32.xlu1 %v1293_v7  ;;  %v1290_v37 = vsel %vm353_vm9, %v3091_v34, 0.0 }
 0x3ab   :  { %1291 = vadd.xlane.f32.xlu0 %v1290_v37  ;;  %v1287_v38 = vsel %vm353_vm9, %v3095_v36, 0.0 }
 0x3ae   :  { %1288 = vadd.xlane.f32.xlu1 %v1287_v38 }
 0x3c1   :  { %v1253_v39 = vpop.xlane.xlu1 %1252  ;;  %v1250_v40 = vpop.xlane.xlu0 %1249 }
 0x3c2   :  { %v1263_v42 = vsub.f32 %v1114_v1, %v1253_v39  ;;  %v1262_v43 = vsub.f32 %v999_v0, %v1250_v40 }
 0x3c4   :  { %v1277_v44 = vmul.f32 1.442695, %v1263_v42  ;;  %v1275_v45 = vmul.f32 1.442695, %v1262_v43  ;;  %v2118_v42 = vld [vmem:[#allocation7] sm:$0xff]  ;;  %v2119_v43 = vld [vmem:[#allocation7 + $0x8] sm:$0xff] }
 0x3c5   :  { %v1322_v46 = vpop.permute.xlu1 %1321  ;;  %v1256_v47 = vpop.xlane.xlu0 %1255 }
 0x3c6   :  { %2489 = vpow2.f32 %v1277_v44  ;;  %v1264_v48 = vsub.f32 %v1229_v11, %v1256_v47  ;;  %2396 = vmatpush3.msra.mxu0 %v1322_v46  ;;  %v2454_v44 = vpack.c.bf16 %v2119_v43, %v2118_v42  ;;  %v2121_v46 = vld [vmem:[#allocation7 + $0x18] sm:$0xff] }
 0x3c7   :  { %2491 = vpow2.f32 %v1275_v45  ;;  %2405 = vmatprep.subr.mxu0 %v2614_v8  ;;  %v2120_v45 = vld [vmem:[#allocation7 + $0x10] sm:$0xff] }
 0x3c8   :  { %v1279_v49 = vmul.f32 1.442695, %v1264_v48  ;;  %v2458_v47 = vpack.c.bf16 %v2121_v46, %v2120_v45  ;;  %v2620_v48 = vmov 1966171168  }
 0x3c9   :  { %v1398_v50 = vpop.permute.xlu0 %1397  ;;  %v1474_v57 = vpop.permute.xlu1 %1473 }
 0x3ca   :  { %2493 = vpow2.f32 %v1279_v49  ;;  %2401 = vmatpush3.msra.mxu1 %v1398_v50  ;;  %v1964_v49 = vunpack.c.l.s4 %v2620_v48 }
 0x3cb   :  { %2410 = vmatprep.subr.mxu1 %v2614_v8 }
 0x3cd   :  { %v1550_v58 = vpop.permute.xlu1 %1549 }
 0x3d0   :  { %v3103_v51 = vpop.eup %2489 }
 0x3d1   :  { %v3105_v52 = vpop.eup %2491  ;;  %v1299_v53 = vsel %vm353_vm9, %v3103_v51, 0.0  ;;  %v1702_v59 = vpop.permute.xlu1 %1701 }
 0x3d2   :  { %1300 = vadd.xlane.f32.xlu1 %v1299_v53  ;;  %v1296_v54 = vsel %vm353_vm9, %v3105_v52, 0.0 }
 0x3d3   :  { %1297 = vadd.xlane.f32.xlu0 %v1296_v54 }
 0x3d4   :  { %v3111_v55 = vpop.eup %2493 }
 0x3d5   :  { %v1302_v56 = vsel %vm353_vm9, %v3111_v55, 0.0 }
 0x3d7   :  { %1303 = vadd.xlane.f32.xlu0 %v1302_v56 }
 0x3e3   :  { %1853 = vrot.lane.b32.xlu1 %v3013_v41, %s2617_s10  ;;  %v1626_v41 = vpop.permute.xlu0 %1625 }
 0x3ed   :  { %1777 = vrot.lane.b32.xlu0 %v3002_v35, %s2617_s10 }
 0x402   :  { %v1283_v29 = vpop.xlane.xlu1 %1282 }
 0x403   :  { %2495 = vrcp.f32 %v1283_v29 }
 0x40d   :  { %v2496_v60 = vpop.eup %2495 }
 0x40e   :  { %v1306_v62 = vmul.f32 %v2496_v60, %v3084_v2 }
 0x410   :  { %2398 = vmatmul.mubr.msk.f32.vlgmr.msra.gmra.mrb[6].mxu0 %vm353_vm9, %v1306_v62 }
 0x411   :  { %2406 = vmatpush3.msra.mxu0 %v1474_v57  ;;  %2407 = vmatprep.mubr.msk.f32.mxu0 %vm2615_vm8, %v2614_v8 }
 0x412   :  { %2415 = vmatprep.subr.mxu0 %v2614_v8 }
 0x42f   :  { %v1286_v63 = vpop.xlane.xlu0 %1285 }
 0x430   :  { %2497 = vrcp.f32 %v1286_v63 }
 0x437   :  { %v1295_v35 = vpop.xlane.xlu1 %1294 }
 0x438   :  { %v1292_v0 = vpop.xlane.xlu0 %1291 }
 0x439   :  { %2499 = vrcp.f32 %v1292_v0 }
 0x43a   :  { %v2498_v1 = vpop.eup %2497 }
 0x43b   :  { %v1308_v4 = vmul.f32 %v2498_v1, %v2482_v32  ;;  %v1289_v6 = vpop.xlane.xlu1 %1288 }
 0x43c   :  { %2501 = vrcp.f32 %v1289_v6 }
 0x43d   :  { %2403 = vmatmul.mubr.msk.f32.vlgmr.msra.gmra.mrb[12].mxu1 %vm353_vm9, %v1308_v4  ;;  %2503 = vrcp.f32 %v1295_v35 }
 0x43e   :  { %2411 = vmatpush3.msra.mxu1 %v1550_v58  ;;  %2412 = vmatprep.mubr.msk.f32.mxu1 %vm2615_vm8, %v2614_v8 }
 0x43f   :  { %2420 = vmatprep.subr.mxu1 %v2614_v8 }
 0x443   :  { %v2500_v9 = vpop.eup %2499 }
 0x444   :  { %v1312_v10 = vmul.f32 %v2500_v9, %v3091_v34 }
 0x446   :  { %v2502_v11 = vpop.eup %2501  ;;  %2413 = vmatmul.mubr.msk.f32.vlgmr.msra.gmra.mrb[14].mxu1 %vm353_vm9, %v1312_v10 }
 0x447   :  { %v1310_v13 = vmul.f32 %v2502_v11, %v3095_v36  ;;  %2421 = vmatpush3.msra.mxu1 %v1702_v59  ;;  %2422 = vmatprep.mubr.msk.f32.mxu1 %vm2615_vm8, %v2614_v8  ;;  %v2504_v17 = vpop.eup %2503 }
 0x448   :  { %2430 = vmatprep.subr.mxu1 %v2614_v8  ;;  %v1314_v18 = vmul.f32 %v2504_v17, %v3089_v33 }
 0x449   :  { %2408 = vmatmul.mubr.msk.f32.vlgmr.msra.gmra.mrb[8].mxu0 %vm353_vm9, %v1310_v13 }
 0x44a   :  { %2416 = vmatpush3.msra.mxu0 %v1626_v41  ;;  %2417 = vmatprep.mubr.msk.f32.mxu0 %vm2615_vm8, %v2614_v8 }
 0x44b   :  { %2425 = vmatprep.subr.mxu0 %v2614_v8 }
 0x44d   :  { %2418 = vmatmul.mubr.msk.f32.vlgmr.msra.gmra.mrb[10].mxu0 %vm353_vm9, %v1314_v18 }
 0x44e   :  { %2427 = vmatprep.mubr.msk.f32.mxu0 %vm2615_vm8, %v2614_v8 }
 0x45f   :  { %v1301_v19 = vpop.xlane.xlu1 %1300 }
 0x460   :  { %2505 = vrcp.f32 %v1301_v19  ;;  %v1298_v20 = vpop.xlane.xlu0 %1297 }
 0x461   :  { %2507 = vrcp.f32 %v1298_v20 }
 0x463   :  { %v1854_v23 = vpop.permute.xlu1 %1853 }
 0x464   :  { %v1304_v2 = vpop.xlane.xlu0 %1303 }
 0x465   :  { %2509 = vrcp.f32 %v1304_v2 }
 0x468   :  { %v1778_v21 = vpop.permute.xlu0 %1777 }
 0x469   :  { %2426 = vmatpush3.msra.mxu0 %v1778_v21 }
 0x46a   :  { %v2506_v28 = vpop.eup %2505  ;;  %2455 = vmatprep.subr.bf16.mxu0 %v2454_v44 }
 0x46b   :  { %v2508_v22 = vpop.eup %2507  ;;  %v1318_v15 = vmul.f32 %v2506_v28, %v3103_v51  ;;  %v1965_v51 = vunpack.c.0.s8 %v1964_v49 }
 0x46c   :  { %v1316_v61 = vmul.f32 %v2508_v22, %v3105_v52 }
 0x46d   :  { %2428 = vmatmul.mubr.msk.f32.vlgmr.msra.gmra.mrb[12].mxu0 %vm353_vm9, %v1318_v15 }
 0x46e   :  { %2423 = vmatmul.mubr.msk.f32.vlgmr.msra.gmra.mrb[16].mxu1 %vm353_vm9, %v1316_v61  ;;  %2457 = vmatpush3.bf16.msra.mxu0 %v2454_v44 }
 0x46f   :  { %v2510_v24 = vpop.eup %2509  ;;  %2431 = vmatpush3.msra.mxu1 %v1854_v23  ;;  %2432 = vmatprep.mubr.msk.f32.mxu1 %vm2615_vm8, %v2614_v8 }
 0x470   :  { %v1320_v5 = vmul.f32 %v2510_v24, %v3111_v55  ;;  %2459 = vmatprep.subr.bf16.mxu0 %v2458_v47  ;;  %v1968_v55 = vsub.s32 %v1965_v51, %v2706_v12 }
 0x472   :  { %2433 = vmatmul.mubr.msk.f32.vlgmr.msra.gmra.mrb[18].mxu1 %vm353_vm9, %v1320_v5  ;;  %2461 = vmatpush3.bf16.msra.mxu0 %v2458_v47 }
 0x4e3   :  { %v1393_v16 = vpop.f32.mrb[6].mxu0 }
 0x4e4   :  { %v2399_v31 = vpop.f32.mrb[7].mxu0 }
 0x510   :  { %v1469_v25 = vpop.f32.mrb[12].mxu1 }
 0x511   :  { %1930 = vrot.lane.b32.xlu0 %v1469_v25, %s2608_s6  ;;  %v2404_v26 = vpop.f32.mrb[13].mxu1 }
 0x519   :  { %v1621_v30 = vpop.f32.mrb[14].mxu1 }
 0x51a   :  { %v2414_v32 = vpop.f32.mrb[15].mxu1 }
 0x51c   :  { %v1545_v3 = vpop.f32.mrb[8].mxu0 }
 0x51d   :  { %v2409_v33 = vpop.f32.mrb[9].mxu0 }
 0x520   :  { %v1697_v34 = vpop.f32.mrb[10].mxu0 }
 0x521   :  { %v2419_v7 = vpop.f32.mrb[11].mxu0 }
 0x540   :  { %v1849_v36 = vpop.f32.mrb[12].mxu0 }
 0x541   :  { %v1773_v37 = vpop.f32.mrb[16].mxu1  ;;  %1951 = vrot.lane.b32.xlu1 %v1849_v36, %s2618_s11  ;;  %v2429_v8 = vpop.f32.mrb[13].mxu0 }
 0x542   :  { %1947 = vrot.lane.b32.xlu0 %v1773_v37, %s2608_s6  ;;  %v2424_v38 = vpop.f32.mrb[17].mxu1 }
 0x545   :  { %v1925_v39 = vpop.f32.mrb[18].mxu1 }
 0x546   :  { %1934 = vrot.lane.b32.xlu0 %v1545_v3, %s2618_s11  ;;  %v2434_v40 = vpop.f32.mrb[19].mxu1  ;;  %1955 = vrot.lane.b32.xlu1 %v1925_v39, %s2619_s12 }
 0x54a   :  { %1938 = vrot.lane.b32.xlu1 %v1621_v30, %s2619_s12 }
 0x583   :  { %v1931_v50 = vpop.permute.xlu0 %1930 }
 0x584   :  { %v1941_v62 = vsel %vm353_vm9, %v1393_v16, %v1931_v50 }
 0x5b3   :  { %v1952_v52 = vpop.permute.xlu1 %1951 }
 0x5b4   :  { %v1948_v53 = vpop.permute.xlu0 %1947 }
 0x5b5   :  { %v1958_v54 = vsel %vm353_vm9, %v1697_v34, %v1948_v53  ;;  %v2297_v53 = vld [vmem:[%s3201_s4] ss:$0 sm:$0xff] }
 0x5b6   :  { %v1959_v57 = vsel %vm1942_vm10, %v1958_v54, %v1952_v52 }
 0x5b8   :  { %v1956_v56 = vpop.permute.xlu1 %1955  ;;  %v1935_v59 = vpop.permute.xlu0 %1934 }
 0x5b9   :  { %v1960_v58 = vsel %vm1944_vm11, %v1959_v57, %v1956_v56  ;;  %v1943_v0 = vsel %vm1942_vm10, %v1941_v62, %v1935_v59 }
 0x5ba   :  { %v2020_v29 = vcombine.high %v1960_v58, %v1960_v58  ;;  %v2027_v60 = vrot.slane %v1960_v58, %v1968_v55 }
 0x5bc   :  { %v2034_v41 = vrot.slane %v2020_v29, %v1968_v55  ;;  %v2035_v63 = vcombine.high %v2027_v60, %v2027_v60  ;;  %v2043_v35 = vrot.slane %v2027_v60, %v1968_v55  ;;  %v1939_v1 = vpop.permute.xlu1 %1938 }
 0x5bd   :  { %v1945_v4 = vsel %vm1944_vm11, %v1943_v0, %v1939_v1 }
 0x5be   :  { %v2036_v6 = vcombine.high %v2034_v41, %v2034_v41  ;;  %v2050_v9 = vrot.slane %v2034_v41, %v1968_v55  ;;  %v2057_v10 = vrot.slane %v2035_v63, %v1968_v55  ;;  %v2065_v11 = vcombine.high %v2043_v35, %v2043_v35 }
 0x5bf   :  { %v1962_v12 = vcombine.high %v1945_v4, %v1945_v4  ;;  %v1969_v13 = vrot.slane %v1945_v4, %v1968_v55  ;;  %v2072_v28 = vrot.slane %v2043_v35, %v2728_v27 }
 0x5c0   :  { %v2064_v17 = vrot.slane %v2036_v6, %v1968_v55  ;;  %v2066_v18 = vcombine.high %v2050_v9, %v2050_v9  ;;  %v2067_v19 = vcombine.high %v2057_v10, %v2057_v10  ;;  %v2076_v22 = vrot.slane %v2057_v10, %v2728_v27 }
 0x5c1   :  { %v1976_v20 = vrot.slane %v1962_v12, %v1968_v55  ;;  %v1977_v2 = vcombine.high %v1969_v13, %v1969_v13  ;;  %v2080_v15 = vrot.slane %v2065_v11, %v2728_v27  ;;  %v1985_v23 = vrot.slane %v1969_v13, %v1968_v55 }
 0x5c2   :  { %v2068_v21 = vcombine.high %v2064_v17, %v2064_v17  ;;  %v2084_v16 = vrot.slane %v2067_v19, %v2728_v27  ;;  %v2088_v31 = vrot.slane %v2050_v9, %v2728_v27  ;;  %v2092_v25 = vrot.slane %v2064_v17, %v2728_v27 }
 0x5c3   :  { %v1978_v61 = vcombine.high %v1976_v20, %v1976_v20  ;;  %v1992_v24 = vrot.slane %v1976_v20, %v1968_v55  ;;  %v1999_v5 = vrot.slane %v1977_v2, %v1968_v55  ;;  %v2096_v26 = vrot.slane %v2066_v18, %v2728_v27 }
 0x5c4   :  { %v2007_v32 = vcombine.high %v1985_v23, %v1985_v23  ;;  %v2100_v34 = vrot.slane %v2068_v21, %v2728_v27  ;;  %v2110_v7 = vsel %vm2109_vm12, %v1985_v23, %v2072_v28 }
 0x5c5   :  { %v2006_v30 = vrot.slane %v1978_v61, %v1968_v55  ;;  %v2008_v3 = vcombine.high %v1992_v24, %v1992_v24  ;;  %v2009_v33 = vcombine.high %v1999_v5, %v1999_v5  ;;  %v2111_v36 = vsel %vm2109_vm12, %v1999_v5, %v2076_v22 }
 0x5c6   :  { %v2114_v37 = vsel %vm2109_vm12, %v1992_v24, %v2088_v31  ;;  %v2112_v38 = vsel %vm2109_vm12, %v2007_v32, %v2080_v15  ;;  %v2137_v42 = vcombine.low %v2110_v7, %v2111_v36 }
 0x5c7   :  { %v2010_v8 = vcombine.high %v2006_v30, %v2006_v30  ;;  %v2115_v39 = vsel %vm2109_vm12, %v2006_v30, %v2092_v25  ;;  %v2116_v40 = vsel %vm2109_vm12, %v2008_v3, %v2096_v26  ;;  %v2113_v44 = vsel %vm2109_vm12, %v2009_v33, %v2084_v16 }
 0x5c8   :  { %v2154_v43 = vcombine.low %v2114_v37, %v2115_v39  ;;  %v2138_v27 = vcombine.low %v2112_v38, %v2113_v44  ;;  %v2145_v47 = vrot.slane %v2137_v42, %v2712_v14 }
 0x5c9   :  { %v2117_v45 = vsel %vm2109_vm12, %v2010_v8, %v2100_v34 }
 0x5ca   :  { %v2155_v46 = vcombine.low %v2116_v40, %v2117_v45  ;;  %v2152_v48 = vrot.slane %v2138_v27, %v2712_v14  ;;  %v2162_v49 = vrot.slane %v2154_v43, %v2712_v14 }
 0x5cc   :  { %v2169_v50 = vrot.slane %v2155_v46, %v2712_v14  ;;  %v2153_v51 = vcombine.low %v2145_v47, %v2152_v48 }
 0x5ce   :  { %v2170_v52 = vcombine.low %v2162_v49, %v2169_v50  ;;  %2443 = vmatprep.mubr.msk.f32.mxu0 %vm75_vm0, %v2153_v51 }
 0x5d0   :  { %2444 = vmatmul.mubr.msk.f32.vlgmr.msra.gmra.mrb[14].mxu0 %vm75_vm0, %v2170_v52 }
 0x6a3   :  { %v2445_v54 = vpop.f32.mrb[14].mxu0 }
 0x6a4   :  { %v2247_v55 = vadd.f32 %v2445_v54, %v2297_v53  ;;  %v2241_v56 = vpop.f32.mrb[15].mxu0 }
 0x6a5   :  { %v2242_v57 = vadd.f32 %v2297_v53, %v2241_v56 }
 0x6a6   :  { %2251 = vst.msk [vmem:[#allocation8 + $0x8] sm:$0xff] %vm75_vm0, %v2247_v55 }
 0x6a7   :  { %2250 = vst.msk [vmem:[#allocation8] sm:$0xff] %vm75_vm0, %v2242_v57 }
 0x6a8   :  { %2588 = shalt.err (!%p2585_p0)
}
 0x6a9   :  { %s2589_s18 = scalar_lea.hbm %s3202_s5, 256 }
 0x6aa   :  { %p2590_p1 = scmp.ne.s32.totalorder %s3202_s5, %s2589_s18  ;;  %p2593_p2 = scmp.lt.u32.totalorder %s2589_s18, %s3202_s5 }
 0x6ac   :  { %p2595_p3 = pnand %p2593_p2, %p2590_p1 }
 0x6ae   :  { %2598 = shalt.err (!%p2595_p3)
}
 0x6af   :  { %2263 = dma.vmem_to_hbm [thread:$0]  %s2258_s16, 256, %s3202_s5, [#allocation4], %s2607_s30, %s2607_s30, %s2608_s6  }
 0x6b0   :  { %2603 = dma.done.wait [#allocation4], 256  }
 0x6b1   :  { %2604 = vsyncadd [#allocation4], 4294967040 }
 0x6b2   :  { %2267 = vsyncpa [#allocation3], 1 }
 0x6b3   :  { %2268 = vsyncpa [#allocation6], 1 }
 0x6b4   :  { %2269 = vsyncpa [#allocation4], 1 }

</bundles_post_ra>
